<compile_context>
chip_gen: v6e
topology: v6e:2x2x1
jax: 0.10.0
libtpu: 0.0.40
codegen_flags: <defaults>
</compile_context>

<pallas_src>
import functools

import jax
import jax.numpy as jnp
from jax.experimental import pallas as pl
from jax.experimental.pallas import tpu as pltpu


# ----------------------------------------------------------------------------
# helpers
# ----------------------------------------------------------------------------
_M_CAP = 256                       # max rows per M tile (256-wide MXU friendly)
_N_TILE_CAPS = (512, 384, 256, 128)


def _round_up(x, m):
    return ((x + m - 1) // m) * m


def _pick_n_tile(Np):
    """Np is a multiple of 128.  Prefer >=2 lane-dense N blocks (megacore on
    v7x) without over-padding; otherwise keep a single full-N block."""
    if Np <= 128:
        return Np
    for tn in _N_TILE_CAPS:
        if tn <= Np // 2 and Np % tn == 0:
            return tn
    return Np


def _m_tiling(B):
    """(Mp, tm): single full-M block when B is small (no padding, no M grid);
    otherwise 256-row tiles (padded rows are sliced off afterwards)."""
    if B <= _M_CAP:
        return B, B
    return _round_up(B, _M_CAP), _M_CAP


# ----------------------------------------------------------------------------
# Pallas kernel: o = relu(x @ Wt + b), whole K reduction in one block.
#   x_ref : (tm, K)  f32   VMEM   (cast to bf16 in-kernel, hides under MXU)
#   w_ref : (K, tn)  bf16  VMEM   (pre-transposed weight)
#   b_ref : (1,  tn) f32   VMEM
#   o_ref : (tm, tn) out   VMEM
# No accumulator scratch, no K grid axis, no init/finalize branches.
# ----------------------------------------------------------------------------
def _linear_bias_relu_kernel(x_ref, w_ref, b_ref, o_ref):
    acc = jnp.dot(x_ref[...].astype(jnp.bfloat16), w_ref[...],
                  preferred_element_type=jnp.float32)
    o_ref[...] = jnp.maximum(acc + b_ref[...], 0.0).astype(o_ref.dtype)


def linear_bias_relu_pallas(x_f32, wt_bf16, b_pad, *, tm, tn,
                            out_dtype=jnp.float32):
    """x_f32: (Mp, K) f32, wt_bf16: (K, Np) bf16, b_pad: (1, Np) f32."""
    Mp, K = x_f32.shape
    _, Np = wt_bf16.shape
    # N outer, M inner: the weight block is revisited across the inner M loop
    # (no re-DMA); x is the streamed operand.
    grid = (Np // tn, Mp // tm)

    # TODO(synk): for very large d_in (x/weight K blocks no longer fitting
    # VMEM) a K-tiled variant accumulating directly into o_ref would be
    # needed; realistic trans_bit values keep the full reduction well under
    # the scoped VMEM budget.
    return pl.pallas_call(
        _linear_bias_relu_kernel,
        out_shape=jax.ShapeDtypeStruct((Mp, Np), out_dtype),
        grid=grid,
        in_specs=[
            pl.BlockSpec((tm, K), lambda j, i: (i, 0)),
            pl.BlockSpec((K, tn), lambda j, i: (0, j)),
            pl.BlockSpec((1, tn), lambda j, i: (0, j)),
        ],
        out_specs=pl.BlockSpec((tm, tn), lambda j, i: (i, j)),
        compiler_params=pltpu.CompilerParams(
            dimension_semantics=("parallel", "parallel")),
    )(x_f32, wt_bf16, b_pad)


# ----------------------------------------------------------------------------
# jitted forward: flatten -> pallas matmul -> slice / reshape (fused by XLA)
# ----------------------------------------------------------------------------
@functools.partial(
    jax.jit,
    static_argnames=("d_out", "num_cat", "Mp", "tm", "tn", "out_dtype"))
def _ournet_forward(x, wt_bf16, b_pad, *, d_out, num_cat, Mp, tm, tn,
                    out_dtype):
    B = x.shape[0]
    x_f = x.reshape(B, -1)                       # flatten (encoder output)
    if Mp != B:                                  # only when B > _M_CAP and ragged
        x_f = jnp.pad(x_f, ((0, Mp - B), (0, 0)))
    y = linear_bias_relu_pallas(x_f, wt_bf16, b_pad, tm=tm, tn=tn,
                                out_dtype=out_dtype)
    return y[:B, :d_out].reshape(B, -1, num_cat)  # (B, trans_bit*2, 8)


# ----------------------------------------------------------------------------
# Our_Net forward
# ----------------------------------------------------------------------------
class OurNetPallas:
    NUM_CATEGORY = 8

    def __init__(self, trans_bit, key, *, out_dtype=jnp.float32):
        # out_dtype=jnp.bfloat16 halves output HBM writeback on v6e/v7x if the
        # downstream decoder accepts it; f32 default keeps v5e happy.
        self.trans_bit = trans_bit
        d_in = trans_bit * 2 * 4 * 4
        d_out = trans_bit * 2 * self.NUM_CATEGORY
        self.d_in, self.d_out = d_in, d_out
        self.out_dtype = out_dtype

        # xavier_normal_ (gain=1) for the weight, matching initialize_weights();
        # PyTorch nn.Linear default uniform(+-1/sqrt(fan_in)) for the bias.
        kw, kb = jax.random.split(key)
        std = (2.0 / (d_in + d_out)) ** 0.5
        w = jax.random.normal(kw, (d_out, d_in), dtype=jnp.float32) * std
        bound = 1.0 / (d_in ** 0.5)
        b = jax.random.uniform(kb, (d_out,), jnp.float32, -bound, bound)
        self.b_f32 = b

        # N padded only to the next multiple of 128 (lane-dense, unmasked vst);
        # K left unpadded (full-extent block).
        self.Np = _round_up(d_out, 128)
        self.tn = _pick_n_tile(self.Np)

        # Hoisted one-time: transpose + N-pad + bf16 cast of the weight.
        wt = jnp.pad(w.T, ((0, 0), (0, self.Np - d_out)))
        self.wt_bf16 = wt.astype(jnp.bfloat16)
        self.b_pad = jnp.pad(b, (0, self.Np - d_out)).reshape(1, self.Np)

    def encoder(self, x):
        # TODO(synk): Encoder(config) source not provided; identity pass-through,
        # so x must already be (B, trans_bit*2, 4, 4).
        return x

    def decoder_recon(self, z):
        # TODO(synk): Decoder_Recon(config) source not provided; identity pass-through.
        return z

    def forward(self, x):
        x_enc = self.encoder(x)
        B = x_enc.shape[0]
        # TODO(synk): bucketize B at serving time if batch sizes vary, to avoid
        # per-B retrace/compile (Mp, tm are static jit args).
        Mp, tm = _m_tiling(B)
        z = _ournet_forward(
            x_enc, self.wt_bf16, self.b_pad,
            d_out=self.d_out, num_cat=self.NUM_CATEGORY,
            Mp=Mp, tm=tm, tn=self.tn, out_dtype=self.out_dtype)
        return self.decoder_recon(z)


# ----------------------------------------------------------------------------
if __name__ == "__main__":
    key = jax.random.PRNGKey(0)
    k_param, k_x = jax.random.split(key)

    trans_bit = 8                      # small config.trans_bit
    B = 2
    # encoder-output-shaped input (NCHW): (B, trans_bit*2, 4, 4)
    x = jax.random.normal(k_x, (B, trans_bit * 2, 4, 4), dtype=jnp.float32)

    net = OurNetPallas(trans_bit, k_param)
    recon = net.forward(x)
    recon = jax.block_until_ready(recon)

    # Reference of the defined path, using the same bf16 MXU operands.
    x_f = x.reshape(B, -1)
    x_eff = x_f.astype(jnp.bfloat16).astype(jnp.float32)
    w_eff = net.wt_bf16[:, :net.d_out].astype(jnp.float32)
    ref = jnp.maximum(x_eff @ w_eff + net.b_f32, 0.0).reshape(B, -1, 8)

    assert recon.shape == (B, trans_bit * 2, 8), recon.shape
    err = float(jnp.max(jnp.abs(recon - ref)))
    assert jnp.allclose(recon, ref, atol=1e-3, rtol=1e-3), err

    print("KERNEL_OK")
</pallas_src>

<mosaic_0001>
module attributes {stable_mosaic.version = 11 : i64} {
  func.func @_linear_bias_relu_kernel(%arg0: i32, %arg1: i32, %arg2: memref<2x256xf32, #tpu.memory_space<vmem>>, %arg3: memref<256x128xbf16, #tpu.memory_space<vmem>>, %arg4: memref<1x128xf32, #tpu.memory_space<vmem>>, %arg5: memref<2x128xf32, #tpu.memory_space<vmem>>) attributes {dimension_semantics = [#tpu.dimension_semantics<parallel>, #tpu.dimension_semantics<parallel>], iteration_bounds = array<i64: 1, 1>, scalar_prefetch = 0 : i64, scratch_operands = 0 : i64, tpu.core_type = #tpu.core_type<tc>, window_params = [{transform_indices = @transform_0, window_bounds = array<i64: 2, 256>}, {transform_indices = @transform_1, window_bounds = array<i64: 256, 128>}, {transform_indices = @transform_2, window_bounds = array<i64: 1, 128>}, {transform_indices = @transform_3, window_bounds = array<i64: 2, 128>}]} {
    %c0 = arith.constant 0 : index
    %c0_0 = arith.constant 0 : index
    %0 = vector.load %arg2[%c0, %c0_0] : memref<2x256xf32, #tpu.memory_space<vmem>>, vector<2x256xf32>
    %1 = arith.truncf %0 : vector<2x256xf32> to vector<2x256xbf16>
    %c0_1 = arith.constant 0 : index
    %c0_2 = arith.constant 0 : index
    %2 = vector.load %arg3[%c0_1, %c0_2] : memref<256x128xbf16, #tpu.memory_space<vmem>>, vector<256x128xbf16>
    %cst = arith.constant dense<0.000000e+00> : vector<2x128xf32>
    %3 = tpu.matmul %1, %2, %cst {dimension_numbers = #tpu.dot_dimension_numbers<[1], [0], [0], [1], [0, 0, 1, 1], [], []>} : vector<2x256xbf16>, vector<256x128xbf16>, vector<2x128xf32> -> vector<2x128xf32>
    %c0_3 = arith.constant 0 : index
    %c0_4 = arith.constant 0 : index
    %4 = vector.load %arg4[%c0_3, %c0_4] : memref<1x128xf32, #tpu.memory_space<vmem>>, vector<1x128xf32>
    %5 = vector.broadcast %4 : vector<1x128xf32> to vector<2x128xf32>
    %6 = arith.addf %3, %5 : vector<2x128xf32>
    %cst_5 = arith.constant 0.000000e+00 : f32
    %7 = vector.broadcast %cst_5 : f32 to vector<2x128xf32>
    %8 = arith.maximumf %6, %7 : vector<2x128xf32>
    %c0_6 = arith.constant 0 : index
    %c0_7 = arith.constant 0 : index
    %9 = vector.load %arg5[%c0_6, %c0_7] : memref<2x128xf32, #tpu.memory_space<vmem>>, vector<2x128xf32>
    tpu.vector_store %arg5[%c0_6, %c0_7], %8 {strides = array<i32>} : memref<2x128xf32, #tpu.memory_space<vmem>>, vector<2x128xf32>,
    return
  }
  func.func @transform_0(%arg0: i32, %arg1: i32) -> (i32, i32) {
    %c0_i32 = arith.constant 0 : i32
    %c0_i32_0 = arith.constant 0 : i32
    return %arg1, %c0_i32 : i32, i32
  }
  func.func @transform_1(%arg0: i32, %arg1: i32) -> (i32, i32) {
    %c0_i32 = arith.constant 0 : i32
    %c0_i32_0 = arith.constant 0 : i32
    return %c0_i32, %arg0 : i32, i32
  }
  func.func @transform_2(%arg0: i32, %arg1: i32) -> (i32, i32) {
    %c0_i32 = arith.constant 0 : i32
    %c0_i32_0 = arith.constant 0 : i32
    return %c0_i32, %arg0 : i32, i32
  }
  func.func @transform_3(%arg0: i32, %arg1: i32) -> (i32, i32) {
    %c0_i32 = arith.constant 0 : i32
    return %arg1, %arg0 : i32, i32
  }
}

</mosaic_0001>

<bundles_post_ra>
// kernel: _ournet_forward.1
= control target key start
LH: loop header
LB: loop body
LE: loop exit
PB: predicated region body
PF: predicated region fallthrough
CT: control target
= control target key end

     0   :  { %s343_s1 = inlined_call_operand.vmem [shape: bf16[256,128], index: 1, kind: input, shape index: {}]   ;;  %s344_s0 = inlined_call_operand.vmem [shape: f32[2,256], index: 0, kind: input, shape index: {}]   ;;  %s345_s2 = inlined_call_operand.vmem [shape: f32[1,128], index: 2, kind: input, shape index: {}]   ;;  %s346_s3 = inlined_call_operand.vmem [shape: f32[2,128], index: 3, kind: output, shape index: {}]  }
   0x1   :  { %v250_v0 = vld [vmem:[%s343_s1 + $0x78] sm:$0xff]   ;;  %v252_v2 = vld [vmem:[%s343_s1 + $0x70] sm:$0xff]   ;;  %v254_v4 = vld [vmem:[%s343_s1 + $0x68] sm:$0xff]  }
   0x2   :  { %v251_v1 = vld [vmem:[%s343_s1 + $0x38] sm:$0xff]   ;;  %228 = vmatprep.subr.bf16.mxu0 %v250_v0  ;;  %v253_v3 = vld [vmem:[%s343_s1 + $0x30] sm:$0xff]   ;;  %v255_v5 = vld [vmem:[%s343_s1 + $0x28] sm:$0xff]  }
   0x3   :  { %229 = vmatpush3.bf16.msra.mxu0 %v251_v1  ;;  %v256_v6 = vld [vmem:[%s343_s1 + $0x60] sm:$0xff]   ;;  %v258_v8 = vld [vmem:[%s343_s1 + $0x58] sm:$0xff]   ;;  %v260_v10 = vld [vmem:[%s343_s1 + $0x50] sm:$0xff]  }
   0x4   :  { %230 = vmatprep.subr.bf16.mxu0 %v252_v2  ;;  %v257_v7 = vld [vmem:[%s343_s1 + $0x20] sm:$0xff]   ;;  %v259_v9 = vld [vmem:[%s343_s1 + $0x18] sm:$0xff]   ;;  %v261_v13 = vld [vmem:[%s343_s1 + $0x10] sm:$0xff]  }
   0x5   :  { %v210_v11 = vld.sshfl [vmem:[%s344_s0] sm:$0x33 pattern:$0x76325410]  ;;  %v262_v15 = vld [vmem:[%s343_s1 + $0x48] sm:$0xff]  }
   0x6   :  { %v24_v12 = vcombine.high %v210_v11, %v210_v11  ;;  %v263_v16 = vld [vmem:[%s343_s1 + $0x8] sm:$0xff]   ;;  %v264_v17 = vld [vmem:[%s343_s1 + $0x40] sm:$0xff]   ;;  %v27_v19 = vpack.c.bf16 %v210_v11, %v210_v11 }
   0x7   :  { %231 = vmatpush3.bf16.msra.mxu0 %v253_v3  ;;  %v265_v18 = vld [vmem:[%s343_s1] sm:$0xff]  }
   0x8   :  { %232 = vmatprep.subr.bf16.mxu0 %v254_v4  ;;  %v28_v14 = vpack.c.bf16 %v24_v12, %v24_v12  ;;  %v211_v21 = vld [vmem:[%s345_s2] ss:$0 sm:$0xff] }
   0xa   :  { %196 = vmatprep.mubr.bf16.mxu0 %v28_v14 }
   0xb   :  { %233 = vmatpush3.bf16.msra.mxu0 %v255_v5 }
   0xc   :  { %234 = vmatprep.subr.bf16.mxu0 %v256_v6 }
   0xf   :  { %235 = vmatpush3.bf16.msra.mxu0 %v257_v7 }
  0x10   :  { %236 = vmatprep.subr.bf16.mxu0 %v258_v8 }
  0x13   :  { %237 = vmatpush3.bf16.msra.mxu0 %v259_v9 }
  0x14   :  { %238 = vmatprep.subr.bf16.mxu0 %v260_v10 }
  0x17   :  { %239 = vmatpush3.bf16.msra.mxu0 %v261_v13 }
  0x18   :  { %240 = vmatprep.subr.bf16.mxu0 %v262_v15 }
  0x1b   :  { %241 = vmatpush3.bf16.msra.mxu0 %v263_v16 }
  0x1c   :  { %242 = vmatprep.subr.bf16.mxu0 %v264_v17 }
  0x1f   :  { %243 = vmatpush3.bf16.msra.mxu0 %v265_v18 }
  0x22   :  { %197 = vmatmul.mubr.bf16.vlgmr.msra.gmra.mxu0 %v27_v19 }
  0xe2   :  { %v244_v20 = vpop.f32.mrf.mxu0 }
  0xe4   :  { %v245_v22 = vpop.f32.mrf.mxu0 }
  0xe5   :  { %v246_v23 = vadd.f32 %v245_v22, %v244_v20 }
  0xe6   :  { %v247_v24 = vpop.f32.mrf.mxu0 }
  0xe7   :  { %v199_v25 = vadd.f32 %v246_v23, %v211_v21 }
  0xe8   :  { %v248_v26 = vpop.f32.mrf.mxu0 }
  0xe9   :  { %v204_v27 = vmax.f32 %v199_v25, 0.0 }
  0xeb   :  { %205 = vst [vmem:[%s346_s3] sm:$0x3] %v204_v27 }

</bundles_post_ra>
